<compile_context>
chip_gen: v5e
topology: v5e:2x2
jax: 0.10.0
libtpu: 0.0.40
codegen_flags: <defaults>
</compile_context>

<pallas_src>
import functools

import jax
import jax.numpy as jnp
from jax.experimental import pallas as pl
from jax.experimental.pallas import tpu as pltpu

EPS = 1e-5  # PyTorch BatchNorm1d default eps


# ----------------------------- Pallas kernel --------------------------------
def linear_block_kernel(x_ref, a1_ref, c1_ref, a2_ref, c2_ref, o_ref):
    x = x_ref[...]
    # layer 1: fused Linear+conv+BN, then ReLU   (dropout = identity in eval)
    y = jnp.dot(x, a1_ref[...], preferred_element_type=jnp.float32) + c1_ref[...]
    y = jnp.maximum(y, 0.0)
    # layer 2: fused Linear+conv+BN, then ReLU
    y = jnp.dot(y, a2_ref[...], preferred_element_type=jnp.float32) + c2_ref[...]
    y = jnp.maximum(y, 0.0)
    # residual
    o_ref[...] = x + y
    # TODO(synk): training-mode dropout (stochastic mask) + batch-stat BN
    # intentionally omitted (eval-mode semantics only).


# --------------------------- wrapper / param fold ----------------------------
def _conv_matrix(cw, L):
    """(L,L) matrix C such that (y @ C)[:, t] = w0*y[:,t-2] + w1*y[:,t] + w2*y[:,t+2]
    with zero padding (same as Conv1d(k=3, dilation=2, padding=2, bias=False))."""
    return (cw[0] * jnp.eye(L, k=2, dtype=jnp.float32)
            + cw[1] * jnp.eye(L, dtype=jnp.float32)
            + cw[2] * jnp.eye(L, k=-2, dtype=jnp.float32))


def _fold_layer(W, b, cw, g, be, m, v, L):
    """Fold Linear -> dilated conv -> BN(eval) into a single affine (A, c)."""
    C = _conv_matrix(cw, L)
    scale = g * jax.lax.rsqrt(v + EPS)        # (1, L)
    A = (W @ C) * scale                       # (L, L)
    c = (b @ C - m) * scale + be              # (1, L)
    return A.astype(jnp.float32), c.astype(jnp.float32)


@functools.partial(jax.jit, static_argnames=("block_b",))
def linear_forward(x, p, *, block_b=128):
    B, L = x.shape
    A1, c1 = _fold_layer(p["W1"], p["b1"], p["cw2"], p["g1"], p["be1"], p["m1"], p["v1"], L)
    A2, c2 = _fold_layer(p["W2"], p["b2"], p["cw3"], p["g2"], p["be2"], p["m2"], p["v2"], L)

    # batch tile: 128-row tiles for large batches, whole (8-padded) batch otherwise
    TB = block_b if B > block_b else max(8, -(-B // 8) * 8)
    Bp = -(-B // TB) * TB
    xp = x if Bp == B else jnp.pad(x, ((0, Bp - B), (0, 0)))

    out = pl.pallas_call(
        linear_block_kernel,
        out_shape=jax.ShapeDtypeStruct((Bp, L), jnp.float32),
        grid=(Bp // TB,),
        in_specs=[
            pl.BlockSpec((TB, L), lambda i: (i, 0)),   # x tile
            pl.BlockSpec((L, L), lambda i: (0, 0)),    # A1 (VMEM-resident)
            pl.BlockSpec((1, L), lambda i: (0, 0)),    # c1
            pl.BlockSpec((L, L), lambda i: (0, 0)),    # A2 (VMEM-resident)
            pl.BlockSpec((1, L), lambda i: (0, 0)),    # c2
        ],
        out_specs=pl.BlockSpec((TB, L), lambda i: (i, 0)),
        compiler_params=pltpu.CompilerParams(dimension_semantics=("parallel",)),
    )(xp, A1, c1, A2, c2)
    return out[:B] if Bp != B else out


# ---------------- pure-JAX reference (un-fused, for correctness) ------------
def _dil_conv_ref(y, w):
    yp = jnp.pad(y, ((0, 0), (2, 2)))
    return w[0] * yp[:, 0:-4] + w[1] * yp[:, 2:-2] + w[2] * yp[:, 4:]


def reference(x, p):
    y = x @ p["W1"] + p["b1"]
    y = _dil_conv_ref(y, p["cw2"])
    y = (y - p["m1"]) / jnp.sqrt(p["v1"] + EPS) * p["g1"] + p["be1"]
    y = jnp.maximum(y, 0.0)
    y = y @ p["W2"] + p["b2"]
    y = _dil_conv_ref(y, p["cw3"])
    y = (y - p["m2"]) / jnp.sqrt(p["v2"] + EPS) * p["g2"] + p["be2"]
    y = jnp.maximum(y, 0.0)
    return x + y


def make_params(key, L):
    ks = jax.random.split(key, 16)
    f = jnp.float32
    return {
        "W1": (jax.random.normal(ks[0], (L, L), f) / jnp.sqrt(L)),
        "b1": 0.1 * jax.random.normal(ks[1], (1, L), f),
        "cw2": 0.5 * jax.random.normal(ks[2], (3,), f),
        "g1": 1.0 + 0.1 * jax.random.normal(ks[3], (1, L), f),
        "be1": 0.1 * jax.random.normal(ks[4], (1, L), f),
        "m1": 0.1 * jax.random.normal(ks[5], (1, L), f),
        "v1": jnp.abs(jax.random.normal(ks[6], (1, L), f)) + 0.5,
        "W2": (jax.random.normal(ks[7], (L, L), f) / jnp.sqrt(L)),
        "b2": 0.1 * jax.random.normal(ks[8], (1, L), f),
        "cw3": 0.5 * jax.random.normal(ks[9], (3,), f),
        "g2": 1.0 + 0.1 * jax.random.normal(ks[10], (1, L), f),
        "be2": 0.1 * jax.random.normal(ks[11], (1, L), f),
        "m2": 0.1 * jax.random.normal(ks[12], (1, L), f),
        "v2": jnp.abs(jax.random.normal(ks[13], (1, L), f)) + 0.5,
    }


if __name__ == "__main__":
    L = 128  # linear_size
    key = jax.random.PRNGKey(0)
    kx1, kx2, kp = jax.random.split(key, 3)
    params = make_params(kp, L)

    # case 1: small batch (single sub-128 tile, matches original module usage)
    x_small = jax.random.normal(kx1, (8, L), jnp.float32)
    out_small = linear_forward(x_small, params)
    jax.block_until_ready(out_small)
    ref_small = reference(x_small, params)
    assert out_small.shape == x_small.shape and out_small.dtype == jnp.float32
    assert jnp.allclose(out_small, ref_small, atol=1e-3, rtol=1e-3), "mismatch (B=8)"

    # case 2: larger, non-tile-multiple batch (exercises the batch grid + padding)
    x_big = jax.random.normal(kx2, (200, L), jnp.float32)
    out_big = linear_forward(x_big, params)
    jax.block_until_ready(out_big)
    ref_big = reference(x_big, params)
    assert out_big.shape == x_big.shape and out_big.dtype == jnp.float32
    assert jnp.allclose(out_big, ref_big, atol=1e-3, rtol=1e-3), "mismatch (B=200)"

    print("KERNEL_OK")
</pallas_src>

<mosaic_0001>
module attributes {stable_mosaic.version = 11 : i64} {
  func.func @linear_block_kernel(%arg0: i32, %arg1: memref<8x128xf32, #tpu.memory_space<vmem>>, %arg2: memref<128x128xf32, #tpu.memory_space<vmem>>, %arg3: memref<1x128xf32, #tpu.memory_space<vmem>>, %arg4: memref<128x128xf32, #tpu.memory_space<vmem>>, %arg5: memref<1x128xf32, #tpu.memory_space<vmem>>, %arg6: memref<8x128xf32, #tpu.memory_space<vmem>>) attributes {dimension_semantics = [#tpu.dimension_semantics<parallel>], iteration_bounds = array<i64: 1>, scalar_prefetch = 0 : i64, scratch_operands = 0 : i64, tpu.core_type = #tpu.core_type<tc>, window_params = [{transform_indices = @transform_0, window_bounds = array<i64: 8, 128>}, {pipeline_mode = #tpu.pipeline_mode<synchronous>, transform_indices = @transform_1, window_bounds = array<i64: 128, 128>}, {pipeline_mode = #tpu.pipeline_mode<synchronous>, transform_indices = @transform_2, window_bounds = array<i64: 1, 128>}, {pipeline_mode = #tpu.pipeline_mode<synchronous>, transform_indices = @transform_3, window_bounds = array<i64: 128, 128>}, {pipeline_mode = #tpu.pipeline_mode<synchronous>, transform_indices = @transform_4, window_bounds = array<i64: 1, 128>}, {transform_indices = @transform_5, window_bounds = array<i64: 8, 128>}]} {
    %c0 = arith.constant 0 : index
    %c0_0 = arith.constant 0 : index
    %0 = vector.load %arg1[%c0, %c0_0] : memref<8x128xf32, #tpu.memory_space<vmem>>, vector<8x128xf32>
    %c0_1 = arith.constant 0 : index
    %c0_2 = arith.constant 0 : index
    %1 = vector.load %arg2[%c0_1, %c0_2] : memref<128x128xf32, #tpu.memory_space<vmem>>, vector<128x128xf32>
    %cst = arith.constant dense<0.000000e+00> : vector<8x128xf32>
    %2 = tpu.matmul %0, %1, %cst {dimension_numbers = #tpu.dot_dimension_numbers<[1], [0], [0], [1], [0, 0, 1, 1], [], []>} : vector<8x128xf32>, vector<128x128xf32>, vector<8x128xf32> -> vector<8x128xf32>
    %c0_3 = arith.constant 0 : index
    %c0_4 = arith.constant 0 : index
    %3 = vector.load %arg3[%c0_3, %c0_4] : memref<1x128xf32, #tpu.memory_space<vmem>>, vector<1x128xf32>
    %4 = vector.broadcast %3 : vector<1x128xf32> to vector<8x128xf32>
    %5 = arith.addf %2, %4 : vector<8x128xf32>
    %cst_5 = arith.constant 0.000000e+00 : f32
    %6 = vector.broadcast %cst_5 : f32 to vector<8x128xf32>
    %7 = arith.maximumf %5, %6 : vector<8x128xf32>
    %c0_6 = arith.constant 0 : index
    %c0_7 = arith.constant 0 : index
    %8 = vector.load %arg4[%c0_6, %c0_7] : memref<128x128xf32, #tpu.memory_space<vmem>>, vector<128x128xf32>
    %cst_8 = arith.constant dense<0.000000e+00> : vector<8x128xf32>
    %9 = tpu.matmul %7, %8, %cst_8 {dimension_numbers = #tpu.dot_dimension_numbers<[1], [0], [0], [1], [0, 0, 1, 1], [], []>} : vector<8x128xf32>, vector<128x128xf32>, vector<8x128xf32> -> vector<8x128xf32>
    %c0_9 = arith.constant 0 : index
    %c0_10 = arith.constant 0 : index
    %10 = vector.load %arg5[%c0_9, %c0_10] : memref<1x128xf32, #tpu.memory_space<vmem>>, vector<1x128xf32>
    %11 = vector.broadcast %10 : vector<1x128xf32> to vector<8x128xf32>
    %12 = arith.addf %9, %11 : vector<8x128xf32>
    %cst_11 = arith.constant 0.000000e+00 : f32
    %13 = vector.broadcast %cst_11 : f32 to vector<8x128xf32>
    %14 = arith.maximumf %12, %13 : vector<8x128xf32>
    %15 = arith.addf %0, %14 : vector<8x128xf32>
    %c0_12 = arith.constant 0 : index
    %c0_13 = arith.constant 0 : index
    %16 = vector.load %arg6[%c0_12, %c0_13] : memref<8x128xf32, #tpu.memory_space<vmem>>, vector<8x128xf32>
    tpu.vector_store %arg6[%c0_12, %c0_13], %15 {strides = array<i32>} : memref<8x128xf32, #tpu.memory_space<vmem>>, vector<8x128xf32>,
    return
  }
  func.func @transform_0(%arg0: i32) -> (i32, i32) {
    %c0_i32 = arith.constant 0 : i32
    %c0_i32_0 = arith.constant 0 : i32
    return %arg0, %c0_i32 : i32, i32
  }
  func.func @transform_1(%arg0: i32) -> (i32, i32) {
    %c0_i32 = arith.constant 0 : i32
    %c0_i32_0 = arith.constant 0 : i32
    %c0_i32_1 = arith.constant 0 : i32
    return %c0_i32, %c0_i32_0 : i32, i32
  }
  func.func @transform_2(%arg0: i32) -> (i32, i32) {
    %c0_i32 = arith.constant 0 : i32
    %c0_i32_0 = arith.constant 0 : i32
    %c0_i32_1 = arith.constant 0 : i32
    return %c0_i32, %c0_i32_0 : i32, i32
  }
  func.func @transform_3(%arg0: i32) -> (i32, i32) {
    %c0_i32 = arith.constant 0 : i32
    %c0_i32_0 = arith.constant 0 : i32
    %c0_i32_1 = arith.constant 0 : i32
    return %c0_i32, %c0_i32_0 : i32, i32
  }
  func.func @transform_4(%arg0: i32) -> (i32, i32) {
    %c0_i32 = arith.constant 0 : i32
    %c0_i32_0 = arith.constant 0 : i32
    %c0_i32_1 = arith.constant 0 : i32
    return %c0_i32, %c0_i32_0 : i32, i32
  }
  func.func @transform_5(%arg0: i32) -> (i32, i32) {
    %c0_i32 = arith.constant 0 : i32
    %c0_i32_0 = arith.constant 0 : i32
    return %arg0, %c0_i32 : i32, i32
  }
}

</mosaic_0001>

<bundles_post_ra>
// kernel: linear_forward.1
= control target key start
LH: loop header
LB: loop body
LE: loop exit
PB: predicated region body
PF: predicated region fallthrough
CT: control target
= control target key end

     0   :  { %s290_s0 = inlined_call_operand.vmem [shape: f32[8,128], index: 0, kind: input, shape index: {}]   ;;  %s291_s1 = inlined_call_operand.vmem [shape: f32[128,128], index: 1, kind: input, shape index: {}]   ;;  %s292_s2 = inlined_call_operand.vmem [shape: f32[1,128], index: 2, kind: input, shape index: {}]   ;;  %s293_s3 = inlined_call_operand.vmem [shape: f32[128,128], index: 3, kind: input, shape index: {}]   ;;  %s294_s4 = inlined_call_operand.vmem [shape: f32[1,128], index: 4, kind: input, shape index: {}]   ;;  %s295_s5 = inlined_call_operand.hbm [shape: f32[8,128], index: 5, kind: output, shape index: {}]  }
   0x1   :  { %v37_v0 = vld [vmem:[%s291_s1 + $0x78] sm:$0xff]  ;;  %v36_v1 = vld [vmem:[%s291_s1 + $0x70] sm:$0xff]  ;;  %v35_v2 = vld [vmem:[%s291_s1 + $0x68] sm:$0xff] }
   0x2   :  { %42 = vmatpush.msra.mxu0 %v37_v0  ;;  %v34_v3 = vld [vmem:[%s291_s1 + $0x60] sm:$0xff]  ;;  %v78_v4 = vld [vmem:[%s293_s3 + $0x78] sm:$0xff]  ;;  %v77_v6 = vld [vmem:[%s293_s3 + $0x70] sm:$0xff] }
   0x3   :  { %v33_v5 = vld [vmem:[%s291_s1 + $0x58] sm:$0xff]  ;;  %83 = vmatpush.msra.mxu1 %v78_v4  ;;  %v76_v7 = vld [vmem:[%s293_s3 + $0x68] sm:$0xff]  ;;  %v32_v8 = vld [vmem:[%s291_s1 + $0x50] sm:$0xff] }
   0x4   :  { %43 = vmatpush.msra.mxu0 %v36_v1  ;;  %v75_v9 = vld [vmem:[%s293_s3 + $0x60] sm:$0xff]  ;;  %v31_v10 = vld [vmem:[%s291_s1 + $0x48] sm:$0xff]  ;;  %v74_v11 = vld [vmem:[%s293_s3 + $0x58] sm:$0xff] }
   0x5   :  { %84 = vmatpush.msra.mxu1 %v77_v6 }
   0x6   :  { %44 = vmatpush.msra.mxu0 %v35_v2 }
   0x7   :  { %85 = vmatpush.msra.mxu1 %v76_v7 }
   0x8   :  { %45 = vmatpush.msra.mxu0 %v34_v3 }
   0xa   :  { %46 = vmatpush.msra.mxu0 %v33_v5 }
   0xc   :  { %47 = vmatpush.msra.mxu0 %v32_v8 }
   0xd   :  { %10 = vsyncpa [#allocation3], 0  ;;  %v30_v12 = vld [vmem:[%s291_s1 + $0x40] sm:$0xff]  ;;  %86 = vmatpush.msra.mxu1 %v75_v9  ;;  %v73_v13 = vld [vmem:[%s293_s3 + $0x50] sm:$0xff]  ;;  %s151_s11 = smov [#allocation2]  }
   0xe   :  { %48 = vmatpush.msra.mxu0 %v31_v10  ;;  %v29_v14 = vld [vmem:[%s291_s1 + $0x38] sm:$0xff]  ;;  %v72_v15 = vld [vmem:[%s293_s3 + $0x48] sm:$0xff]  ;;  %v28_v16 = vld [vmem:[%s291_s1 + $0x30] sm:$0xff]  ;;  %s111_s12 = sshll.u32 %s151_s11, 4  ;;  %s112_s12 = int_to_ptr.vmem [resolvable:$true] %s111_s12 }
   0xf   :  { %87 = vmatpush.msra.mxu1 %v74_v11  ;;  %v71_v17 = vld [vmem:[%s293_s3 + $0x40] sm:$0xff]  ;;  %v27_v18 = vld [vmem:[%s291_s1 + $0x28] sm:$0xff]  ;;  %v70_v19 = vld [vmem:[%s293_s3 + $0x38] sm:$0xff] }
  0x10   :  { %49 = vmatpush.msra.mxu0 %v30_v12  ;;  %v26_v20 = vld [vmem:[%s291_s1 + $0x20] sm:$0xff]  ;;  %v69_v21 = vld [vmem:[%s293_s3 + $0x30] sm:$0xff]  ;;  %v25_v22 = vld [vmem:[%s291_s1 + $0x18] sm:$0xff] }
  0x11   :  { %88 = vmatpush.msra.mxu1 %v73_v13  ;;  %v68_v23 = vld [vmem:[%s293_s3 + $0x28] sm:$0xff]  ;;  %v24_v24 = vld [vmem:[%s291_s1 + $0x10] sm:$0xff]  ;;  %v67_v25 = vld [vmem:[%s293_s3 + $0x20] sm:$0xff] }
  0x12   :  { %50 = vmatpush.msra.mxu0 %v29_v14  ;;  %v23_v26 = vld [vmem:[%s291_s1 + $0x8] sm:$0xff]  ;;  %v66_v27 = vld [vmem:[%s293_s3 + $0x18] sm:$0xff]  ;;  %v22_v28 = vld [vmem:[%s291_s1] sm:$0xff] }
  0x13   :  { %89 = vmatpush.msra.mxu1 %v72_v15  ;;  %v21_v29 = vld [vmem:[%s290_s0] sm:$0xff]  ;;  %v65_v30 = vld [vmem:[%s293_s3 + $0x10] sm:$0xff]  ;;  %v64_v31 = vld [vmem:[%s293_s3 + $0x8] sm:$0xff] }
  0x14   :  { %51 = vmatpush.msra.mxu0 %v28_v16  ;;  %v63_v32 = vld [vmem:[%s293_s3] sm:$0xff]  ;;  %s113_s3 = sshll.u32 %s295_s5, 4  ;;  %s114_s3 = int_to_ptr.hbm [resolvable:$true] %s113_s3 }
  0x15   :  { %90 = vmatpush.msra.mxu1 %v71_v17  ;;  %v123_v33 = vld [vmem:[%s292_s2] ss:$0 sm:$0xff] }
  0x16   :  { %52 = vmatpush.msra.mxu0 %v27_v18  ;;  %v124_v37 = vld [vmem:[%s294_s4] ss:$0 sm:$0xff] }
  0x17   :  { %91 = vmatpush.msra.mxu1 %v70_v19 }
  0x18   :  { %53 = vmatpush.msra.mxu0 %v26_v20 }
  0x19   :  { %92 = vmatpush.msra.mxu1 %v69_v21 }
  0x1a   :  { %54 = vmatpush.msra.mxu0 %v25_v22 }
  0x1b   :  { %93 = vmatpush.msra.mxu1 %v68_v23 }
  0x1c   :  { %55 = vmatpush.msra.mxu0 %v24_v24 }
  0x1d   :  { %94 = vmatpush.msra.mxu1 %v67_v25 }
  0x1e   :  { %56 = vmatpush.msra.mxu0 %v23_v26 }
  0x1f   :  { %95 = vmatpush.msra.mxu1 %v66_v27 }
  0x20   :  { %57 = vmatpush.msra.mxu0 %v22_v28 }
  0x21   :  { %58 = vmatmul.f32.vlgmr.msra.gmra.mxu0 %v21_v29  ;;  %96 = vmatpush.msra.mxu1 %v65_v30 }
  0x23   :  { %97 = vmatpush.msra.mxu1 %v64_v31 }
  0x25   :  { %98 = vmatpush.msra.mxu1 %v63_v32 }
  0x9e   :  { %v59_v34 = vpop.f32.mrf.mxu0 }
  0x9f   :  { %v60_v35 = vadd.f32 %v123_v33, %v59_v34 }
  0xa1   :  { %v62_v36 = vmax.f32 %v60_v35, 0.0 }
  0xa3   :  { %99 = vmatmul.f32.vlgmr.msra.gmra.mxu1 %v62_v36 }
 0x120   :  { %v100_v38 = vpop.f32.mrf.mxu1 }
 0x121   :  { %v101_v39 = vadd.f32 %v124_v37, %v100_v38 }
 0x123   :  { %v103_v40 = vmax.f32 %v101_v39, 0.0 }
 0x125   :  { %v104_v41 = vadd.f32 %v103_v40, %v21_v29 }
 0x127   :  { %105 = vst [vmem:[#allocation2] sm:$0xff] %v104_v41 }
 0x128   :  { %116 = dma.vmem_to_hbm [thread:$0]  %s112_s12, 128, %s114_s3, [#allocation3]  }
 0x129   :  { %149 = dma.done.wait [#allocation3], 128  }
 0x12a   :  { %150 = vsyncadd [#allocation3], 4294967168 }
 0x12b   :  { %121 = vsyncpa [#allocation3], 1 }

</bundles_post_ra>
